<compile_context>
chip_gen: v7x
topology: tpu7x:2x2x1
jax: 0.10.0
libtpu: 0.0.40
codegen_flags: <defaults>
</compile_context>

<pallas_src>
import functools
import math

import jax
import jax.numpy as jnp
from jax import lax
from jax.experimental import pallas as pl
from jax.experimental.pallas import tpu as pltpu


# Budget for keeping the whole intermediate h resident in a VMEM scratch.
_H_SCRATCH_BUDGET_BYTES = 20 * 1024 * 1024


def _fused_gconv_bn_relu_kernel(
        # inputs
        x_ref, w0_ref, w1_ref, a_off_ref, diag_ref, bias_ref,
        gamma_ref, beta_ref,
        # outputs
        y_ref,
        # scratch
        sum_sc, sq_sc, scale_sc, shift_sc, *maybe_h_sc,
        # static config
        tile_batch, num_joints, num_tiles, keep_h, has_pad,
        valid_rows, inv_n, eps):
    """Phase 0: SemGraphConv + BN partial sums.  Phase 1: BN + ReLU."""
    p = pl.program_id(0)          # 0 = gconv + stats, 1 = normalize + relu
    i = pl.program_id(1)          # batch tile index
    TB = tile_batch
    J = num_joints
    TBJ = TB * J
    Cout = y_ref.shape[-1]
    h_sc = maybe_h_sc[0] if keep_h else None

    def compute_out():
        x2d = x_ref[...]                                        # (TBJ, Cin)
        # Two separate matmuls (N = Cout each): avoids the lane-misaligned
        # slice of a fused (Cin, 2*Cout) result when Cout < 128.
        h0 = jnp.dot(x2d, w0_ref[...], preferred_element_type=jnp.float32)
        h1 = jnp.dot(x2d, w1_ref[...], preferred_element_type=jnp.float32)
        # Self-loop path: per-joint scale, pre-tiled to (TBJ, 1) in wrapper.
        self_term = diag_ref[...] * h0                          # (TBJ, Cout)
        # Neighbor aggregation over the small (J, J) off-diagonal adjacency.
        neigh = jnp.einsum('ij,bjd->bid', a_off_ref[...],
                           h1.reshape(TB, J, Cout),
                           preferred_element_type=jnp.float32)  # (TB, J, Cout)
        return self_term + neigh.reshape(TBJ, Cout) + bias_ref[...]

    # ---------------- phase 0: graph conv + exact BN partials ----------------
    @pl.when(p == 0)
    def _phase_gconv():
        @pl.when(i == 0)
        def _init_stats():
            sum_sc[...] = jnp.zeros_like(sum_sc)
            sq_sc[...] = jnp.zeros_like(sq_sc)

        out = compute_out()                                     # f32 (TBJ, Cout)
        if keep_h:
            h_sc[i] = out

        if has_pad:
            # Only the last tile can contain padded (garbage) batch rows.
            @pl.when(i < num_tiles - 1)
            def _accum_full():
                sum_sc[...] += jnp.sum(out, axis=0, keepdims=True)
                sq_sc[...] += jnp.sum(out * out, axis=0, keepdims=True)

            @pl.when(i == num_tiles - 1)
            def _accum_masked():
                r = lax.broadcasted_iota(jnp.int32, (TBJ, 1), 0)
                limit = valid_rows - (num_tiles - 1) * TBJ
                m = (r < limit).astype(jnp.float32)
                om = out * m
                sum_sc[...] += jnp.sum(om, axis=0, keepdims=True)
                sq_sc[...] += jnp.sum(om * om, axis=0, keepdims=True)
        else:
            sum_sc[...] += jnp.sum(out, axis=0, keepdims=True)
            sq_sc[...] += jnp.sum(out * out, axis=0, keepdims=True)

    # ---------------- phase 1: finalize BN, normalize + ReLU -----------------
    @pl.when(p == 1)
    def _phase_bn_relu():
        @pl.when(i == 0)
        def _finalize_stats():
            mean = sum_sc[...] * inv_n                          # (1, Cout)
            var = jnp.maximum(sq_sc[...] * inv_n - mean * mean, 0.0)
            scale = gamma_ref[...] * lax.rsqrt(var + eps)
            scale_sc[...] = scale
            shift_sc[...] = beta_ref[...] - mean * scale

        if keep_h:
            h = h_sc[i]                                         # (TBJ, Cout)
        else:
            h = compute_out()                                   # recompute path
        y = jnp.maximum(h * scale_sc[...] + shift_sc[...], 0.0)
        y_ref[...] = y.astype(y_ref.dtype)


def _pick_tile_batch(B, J, Cin, Cout, budget_bytes=16 * 1024 * 1024):
    # f32 bytes per batch row in flight: double-buffered x block (2*Cin),
    # double-buffered y block (2*Cout), matmul/aggregation temps (~4*Cout),
    # one h-scratch row (Cout).  Keeps totals v7x-safe (64 MiB VMEM).
    bytes_per_row = 4 * J * (2 * Cin + 7 * Cout)
    tb = max(1, budget_bytes // max(1, bytes_per_row))
    return int(min(B, tb))


def _round_tile_batch(tb, B, J):
    """Ensure TB*J is a multiple of 8 (sublane tiling) unless TB == B."""
    if tb >= B:
        return B
    mult = 8 // math.gcd(J, 8)
    tb = ((tb + mult - 1) // mult) * mult
    return int(min(tb, B))


def graph_conv_forward(x, adj_logits, w0, w1, bias, gamma, beta,
                       *, tile_batch=None, eps=1e-5):
    """_GraphConv forward (p_dropout=None). x: (B, J, Cin) -> (B, J, Cout) f32."""
    B, J, Cin = x.shape
    Cout = w0.shape[1]

    # ---- batch-independent adjacency prep, hoisted out of the kernel -------
    a = jax.nn.softmax(adj_logits.astype(jnp.float32), axis=1)
    eye = jnp.eye(J, dtype=jnp.float32)
    diag_a = jnp.sum(a * eye, axis=1).reshape(J, 1)                # (J, 1)
    a_off = (a * (1.0 - eye)).astype(jnp.float32)                  # (J, J)

    # ---- batch tiling -------------------------------------------------------
    TB = tile_batch if tile_batch is not None else _pick_tile_batch(B, J, Cin, Cout)
    TB = _round_tile_batch(int(max(TB, 1)), B, J)
    num_tiles = -(-B // TB)
    Bp = num_tiles * TB
    TBJ = TB * J
    has_pad = Bp != B

    x2 = x.reshape(B * J, Cin)                                     # free reshape
    if has_pad:
        x2 = jnp.pad(x2, ((0, (Bp - B) * J), (0, 0)))

    # Keep the whole intermediate h in VMEM when it fits; otherwise phase 1
    # recomputes it from x (no HBM intermediate in either case).
    keep_h = (Bp * J * Cout * 4) <= _H_SCRATCH_BUDGET_BYTES

    diag_tile = jnp.tile(diag_a, (TB, 1))                          # (TBJ, 1)
    w0c = w0.astype(x.dtype)
    w1c = w1.astype(x.dtype)
    bias_row = bias.reshape(1, Cout).astype(jnp.float32)
    gamma_row = gamma.reshape(1, Cout).astype(jnp.float32)
    beta_row = beta.reshape(1, Cout).astype(jnp.float32)

    kernel = functools.partial(
        _fused_gconv_bn_relu_kernel,
        tile_batch=TB, num_joints=J, num_tiles=num_tiles,
        keep_h=keep_h, has_pad=has_pad,
        valid_rows=B * J, inv_n=1.0 / float(B * J), eps=float(eps))

    if keep_h:
        # Phase 1 maps x to the last phase-0 block index -> no re-DMA of x.
        x_map = lambda p, i: (i * (1 - p) + (num_tiles - 1) * p, 0)
    else:
        x_map = lambda p, i: (i, 0)        # phase 1 re-reads x to recompute h

    scratch_shapes = [pltpu.VMEM((1, Cout), jnp.float32),          # sum
                      pltpu.VMEM((1, Cout), jnp.float32),          # sum of squares
                      pltpu.VMEM((1, Cout), jnp.float32),          # BN scale
                      pltpu.VMEM((1, Cout), jnp.float32)]          # BN shift
    if keep_h:
        scratch_shapes.append(pltpu.VMEM((num_tiles, TBJ, Cout), jnp.float32))

    y2 = pl.pallas_call(
        kernel,
        grid=(2, num_tiles),
        in_specs=[
            pl.BlockSpec((TBJ, Cin), x_map),
            pl.BlockSpec((Cin, Cout), lambda p, i: (0, 0)),
            pl.BlockSpec((Cin, Cout), lambda p, i: (0, 0)),
            pl.BlockSpec((J, J), lambda p, i: (0, 0)),
            pl.BlockSpec((TBJ, 1), lambda p, i: (0, 0)),
            pl.BlockSpec((1, Cout), lambda p, i: (0, 0)),
            pl.BlockSpec((1, Cout), lambda p, i: (0, 0)),
            pl.BlockSpec((1, Cout), lambda p, i: (0, 0)),
        ],
        out_specs=pl.BlockSpec((TBJ, Cout), lambda p, i: (i * p, 0)),
        out_shape=jax.ShapeDtypeStruct((Bp * J, Cout), jnp.float32),
        scratch_shapes=scratch_shapes,
        compiler_params=pltpu.CompilerParams(
            # Shared BN-stats scratch + phase ordering need sequential grid.
            dimension_semantics=("arbitrary", "arbitrary"),
            vmem_limit_bytes=48 * 1024 * 1024),
    )(x2, w0c, w1c, a_off, diag_tile, bias_row, gamma_row, beta_row)

    y = y2.reshape(Bp, J, Cout)
    # TODO(synk): dropout branch (p_dropout is not None) omitted; would need
    # pltpu.prng_seed + pltpu.stateful_bernoulli in phase 1.
    return y if Bp == B else y[:B]


if __name__ == "__main__":
    key = jax.random.PRNGKey(0)
    B, J, Cin, Cout = 2, 16, 32, 32

    k_x, k_w, k_b = jax.random.split(key, 3)
    x = jax.random.normal(k_x, (B, J, Cin), dtype=jnp.float32)

    # Synthetic graph adjacency: ring over J joints + self loops.
    idx = jnp.arange(J)
    adj = jnp.zeros((J, J), jnp.float32)
    adj = adj.at[idx, idx].set(1.0)
    adj = adj.at[idx, (idx + 1) % J].set(1.0)
    adj = adj.at[idx, (idx - 1) % J].set(1.0)

    # SemGraphConv parameters (deterministic, matching __init__ semantics).
    gain = 1.414
    limit = gain * (6.0 / (Cin + Cout)) ** 0.5
    W = jax.random.uniform(k_w, (2, Cin, Cout), jnp.float32, -limit, limit)
    stdv = 1.0 / (Cout ** 0.5)
    bias = jax.random.uniform(k_b, (Cout,), jnp.float32, -stdv, stdv)
    # e init = 1.0 over nonzero edges -> masked logits precomputed.
    adj_logits = jnp.where(adj > 0, 1.0, -9e15).astype(jnp.float32)

    # BatchNorm1d default parameters.
    gamma = jnp.ones((Cout,), jnp.float32)
    beta = jnp.zeros((Cout,), jnp.float32)

    # Pure-JAX reference (training-mode BN, biased variance).
    a = jax.nn.softmax(adj_logits, axis=1)
    eye = jnp.eye(J, dtype=jnp.float32)
    h0 = jnp.einsum('bjc,cd->bjd', x, W[0])
    h1 = jnp.einsum('bjc,cd->bjd', x, W[1])
    ref = (jnp.einsum('ij,bjd->bid', a * eye, h0)
           + jnp.einsum('ij,bjd->bid', a * (1.0 - eye), h1)
           + bias[None, None, :])
    mean = ref.mean(axis=(0, 1))
    var = ((ref - mean) ** 2).mean(axis=(0, 1))
    ref = (ref - mean) * jax.lax.rsqrt(var + 1e-5) * gamma + beta
    ref = jnp.maximum(ref, 0.0)

    # Single-tile (num_tiles = 1) fused path.
    out = graph_conv_forward(x, adj_logits, W[0], W[1], bias, gamma, beta)
    out = jax.block_until_ready(out)
    assert out.shape == (B, J, Cout) and out.dtype == jnp.float32
    assert jnp.allclose(out, ref, atol=5e-2, rtol=5e-2), (
        "max abs diff = %f" % float(jnp.max(jnp.abs(out - ref))))

    # Multi-tile path (grid = (2, 2)) exercising the tiled phase structure.
    out2 = graph_conv_forward(x, adj_logits, W[0], W[1], bias, gamma, beta,
                              tile_batch=1)
    out2 = jax.block_until_ready(out2)
    assert jnp.allclose(out2, ref, atol=5e-2, rtol=5e-2), (
        "max abs diff (tiled) = %f" % float(jnp.max(jnp.abs(out2 - ref))))

    print("KERNEL_OK")
</pallas_src>

<mosaic_0001>
module attributes {stable_mosaic.version = 11 : i64} {
  func.func @_fused_gconv_bn_relu_kernel(%arg0: i32, %arg1: i32, %arg2: memref<32x32xf32, #tpu.memory_space<vmem>>, %arg3: memref<32x32xf32, #tpu.memory_space<vmem>>, %arg4: memref<32x32xf32, #tpu.memory_space<vmem>>, %arg5: memref<16x16xf32, #tpu.memory_space<vmem>>, %arg6: memref<32x1xf32, #tpu.memory_space<vmem>>, %arg7: memref<1x32xf32, #tpu.memory_space<vmem>>, %arg8: memref<1x32xf32, #tpu.memory_space<vmem>>, %arg9: memref<1x32xf32, #tpu.memory_space<vmem>>, %arg10: memref<32x32xf32, #tpu.memory_space<vmem>>, %arg11: memref<1x32xf32, #tpu.memory_space<vmem>>, %arg12: memref<1x32xf32, #tpu.memory_space<vmem>>, %arg13: memref<1x32xf32, #tpu.memory_space<vmem>>, %arg14: memref<1x32xf32, #tpu.memory_space<vmem>>, %arg15: memref<1x32x32xf32, #tpu.memory_space<vmem>>) attributes {dimension_semantics = [#tpu.dimension_semantics<arbitrary>, #tpu.dimension_semantics<arbitrary>], iteration_bounds = array<i64: 2, 1>, scalar_prefetch = 0 : i64, scratch_operands = 5 : i64, tpu.core_type = #tpu.core_type<tc>, window_params = [{transform_indices = @transform_0, window_bounds = array<i64: 32, 32>}, {pipeline_mode = #tpu.pipeline_mode<synchronous>, transform_indices = @transform_1, window_bounds = array<i64: 32, 32>}, {pipeline_mode = #tpu.pipeline_mode<synchronous>, transform_indices = @transform_2, window_bounds = array<i64: 32, 32>}, {pipeline_mode = #tpu.pipeline_mode<synchronous>, transform_indices = @transform_3, window_bounds = array<i64: 16, 16>}, {pipeline_mode = #tpu.pipeline_mode<synchronous>, transform_indices = @transform_4, window_bounds = array<i64: 32, 1>}, {pipeline_mode = #tpu.pipeline_mode<synchronous>, transform_indices = @transform_5, window_bounds = array<i64: 1, 32>}, {pipeline_mode = #tpu.pipeline_mode<synchronous>, transform_indices = @transform_6, window_bounds = array<i64: 1, 32>}, {pipeline_mode = #tpu.pipeline_mode<synchronous>, transform_indices = @transform_7, window_bounds = array<i64: 1, 32>}, {transform_indices = @transform_8, window_bounds = array<i64: 32, 32>}]} {
    %c0_i32 = arith.constant 0 : i32
    %0 = arith.cmpi eq, %arg0, %c0_i32 : i32
    %1 = arith.extui %0 : i1 to i32
    %c0_i32_0 = arith.constant 0 : i32
    %2 = arith.cmpi ne, %1, %c0_i32_0 : i32
    scf.if %2 {
      %c0_i32_2 = arith.constant 0 : i32
      %6 = arith.cmpi eq, %arg1, %c0_i32_2 : i32
      %7 = arith.extui %6 : i1 to i32
      %c0_i32_3 = arith.constant 0 : i32
      %8 = arith.cmpi ne, %7, %c0_i32_3 : i32
      scf.if %8 {
        %cst_29 = arith.constant 0.000000e+00 : f32
        %41 = vector.broadcast %cst_29 : f32 to vector<1x32xf32>
        %c0_30 = arith.constant 0 : index
        %c0_31 = arith.constant 0 : index
        %42 = vector.load %arg11[%c0_30, %c0_31] : memref<1x32xf32, #tpu.memory_space<vmem>>, vector<1x32xf32>
        tpu.vector_store %arg11[%c0_30, %c0_31], %41 {strides = array<i32>} : memref<1x32xf32, #tpu.memory_space<vmem>>, vector<1x32xf32>,
        %cst_32 = arith.constant 0.000000e+00 : f32
        %43 = vector.broadcast %cst_32 : f32 to vector<1x32xf32>
        %c0_33 = arith.constant 0 : index
        %c0_34 = arith.constant 0 : index
        %44 = vector.load %arg12[%c0_33, %c0_34] : memref<1x32xf32, #tpu.memory_space<vmem>>, vector<1x32xf32>
        tpu.vector_store %arg12[%c0_33, %c0_34], %43 {strides = array<i32>} : memref<1x32xf32, #tpu.memory_space<vmem>>, vector<1x32xf32>,
      } else {
      }
      %c0 = arith.constant 0 : index
      %c0_4 = arith.constant 0 : index
      %9 = vector.load %arg2[%c0, %c0_4] : memref<32x32xf32, #tpu.memory_space<vmem>>, vector<32x32xf32>
      %c0_5 = arith.constant 0 : index
      %c0_6 = arith.constant 0 : index
      %10 = vector.load %arg3[%c0_5, %c0_6] : memref<32x32xf32, #tpu.memory_space<vmem>>, vector<32x32xf32>
      %cst = arith.constant dense<0.000000e+00> : vector<32x32xf32>
      %11 = tpu.matmul %9, %10, %cst {dimension_numbers = #tpu.dot_dimension_numbers<[1], [0], [0], [1], [0, 0, 1, 1], [], []>} : vector<32x32xf32>, vector<32x32xf32>, vector<32x32xf32> -> vector<32x32xf32>
      %c0_7 = arith.constant 0 : index
      %c0_8 = arith.constant 0 : index
      %12 = vector.load %arg4[%c0_7, %c0_8] : memref<32x32xf32, #tpu.memory_space<vmem>>, vector<32x32xf32>
      %cst_9 = arith.constant dense<0.000000e+00> : vector<32x32xf32>
      %13 = tpu.matmul %9, %12, %cst_9 {dimension_numbers = #tpu.dot_dimension_numbers<[1], [0], [0], [1], [0, 0, 1, 1], [], []>} : vector<32x32xf32>, vector<32x32xf32>, vector<32x32xf32> -> vector<32x32xf32>
      %c0_10 = arith.constant 0 : index
      %c0_11 = arith.constant 0 : index
      %14 = vector.load %arg6[%c0_10, %c0_11] : memref<32x1xf32, #tpu.memory_space<vmem>>, vector<32x1xf32>
      %15 = vector.broadcast %14 : vector<32x1xf32> to vector<32x32xf32>
      %16 = arith.mulf %15, %11 : vector<32x32xf32>
      %c0_12 = arith.constant 0 : index
      %c0_13 = arith.constant 0 : index
      %17 = vector.load %arg5[%c0_12, %c0_13] : memref<16x16xf32, #tpu.memory_space<vmem>>, vector<16x16xf32>
      %18 = vector.shape_cast %13 : vector<32x32xf32> to vector<2x16x32xf32>
      "tpu.trace_start"() <{level = 10 : i32, message = "ij,bjd->bid"}> : () -> ()
      %cst_14 = arith.constant dense<0.000000e+00> : vector<2x32x16xf32>
      %19 = tpu.matmul %18, %17, %cst_14 {dimension_numbers = #tpu.dot_dimension_numbers<[1], [1], [0, 2], [0], [0, 0, 0, 2, 1, 0], [], []>} : vector<2x16x32xf32>, vector<16x16xf32>, vector<2x32x16xf32> -> vector<2x32x16xf32>
      %20 = tpu.transpose %19, [0, 2, 1] : vector<2x32x16xf32> -> vector<2x16x32xf32>
      "tpu.trace_stop"() : () -> ()
      %21 = vector.shape_cast %20 : vector<2x16x32xf32> to vector<32x32xf32>
      %22 = arith.addf %16, %21 : vector<32x32xf32>
      %c0_15 = arith.constant 0 : index
      %c0_16 = arith.constant 0 : index
      %23 = vector.load %arg7[%c0_15, %c0_16] : memref<1x32xf32, #tpu.memory_space<vmem>>, vector<1x32xf32>
      %24 = vector.broadcast %23 : vector<1x32xf32> to vector<32x32xf32>
      %25 = arith.addf %22, %24 : vector<32x32xf32>
      %26 = arith.index_cast %arg1 : i32 to index
      %c0_17 = arith.constant 0 : index
      %c0_18 = arith.constant 0 : index
      %27 = vector.load %arg15[%26, %c0_17, %c0_18] : memref<1x32x32xf32, #tpu.memory_space<vmem>>, vector<1x32x32xf32>
      %28 = vector.shape_cast %27 : vector<1x32x32xf32> to vector<32x32xf32>
      %29 = vector.shape_cast %25 : vector<32x32xf32> to vector<1x32x32xf32>
      tpu.vector_store %arg15[%26, %c0_17, %c0_18], %29 {strides = array<i32>} : memref<1x32x32xf32, #tpu.memory_space<vmem>>, vector<1x32x32xf32>,
      %c0_19 = arith.constant 0 : index
      %c0_20 = arith.constant 0 : index
      %30 = vector.load %arg11[%c0_19, %c0_20] : memref<1x32xf32, #tpu.memory_space<vmem>>, vector<1x32xf32>
      %cst_21 = arith.constant dense<0.000000e+00> : vector<32xf32>
      %31 = vector.multi_reduction <add>, %25, %cst_21 [0] : vector<32x32xf32> to vector<32xf32>
      %32 = vector.shape_cast %31 : vector<32xf32> to vector<1x32xf32>
      %33 = arith.addf %30, %32 : vector<1x32xf32>
      %c0_22 = arith.constant 0 : index
      %c0_23 = arith.constant 0 : index
      %34 = vector.load %arg11[%c0_22, %c0_23] : memref<1x32xf32, #tpu.memory_space<vmem>>, vector<1x32xf32>
      tpu.vector_store %arg11[%c0_22, %c0_23], %33 {strides = array<i32>} : memref<1x32xf32, #tpu.memory_space<vmem>>, vector<1x32xf32>,
      %c0_24 = arith.constant 0 : index
      %c0_25 = arith.constant 0 : index
      %35 = vector.load %arg12[%c0_24, %c0_25] : memref<1x32xf32, #tpu.memory_space<vmem>>, vector<1x32xf32>
      %36 = arith.mulf %25, %25 : vector<32x32xf32>
      %cst_26 = arith.constant dense<0.000000e+00> : vector<32xf32>
      %37 = vector.multi_reduction <add>, %36, %cst_26 [0] : vector<32x32xf32> to vector<32xf32>
      %38 = vector.shape_cast %37 : vector<32xf32> to vector<1x32xf32>
      %39 = arith.addf %35, %38 : vector<1x32xf32>
      %c0_27 = arith.constant 0 : index
      %c0_28 = arith.constant 0 : index
      %40 = vector.load %arg12[%c0_27, %c0_28] : memref<1x32xf32, #tpu.memory_space<vmem>>, vector<1x32xf32>
      tpu.vector_store %arg12[%c0_27, %c0_28], %39 {strides = array<i32>} : memref<1x32xf32, #tpu.memory_space<vmem>>, vector<1x32xf32>,
    } else {
    }
    %c1_i32 = arith.constant 1 : i32
    %3 = arith.cmpi eq, %arg0, %c1_i32 : i32
    %4 = arith.extui %3 : i1 to i32
    %c0_i32_1 = arith.constant 0 : i32
    %5 = arith.cmpi ne, %4, %c0_i32_1 : i32
    scf.if %5 {
      %c0_i32_2 = arith.constant 0 : i32
      %6 = arith.cmpi eq, %arg1, %c0_i32_2 : i32
      %7 = arith.extui %6 : i1 to i32
      %c0_i32_3 = arith.constant 0 : i32
      %8 = arith.cmpi ne, %7, %c0_i32_3 : i32
      scf.if %8 {
        %c0_11 = arith.constant 0 : index
        %c0_12 = arith.constant 0 : index
        %21 = vector.load %arg11[%c0_11, %c0_12] : memref<1x32xf32, #tpu.memory_space<vmem>>, vector<1x32xf32>
        %cst_13 = arith.constant 3.125000e-02 : f32
        %22 = vector.broadcast %cst_13 : f32 to vector<1x32xf32>
        %23 = arith.mulf %21, %22 : vector<1x32xf32>
        %c0_14 = arith.constant 0 : index
        %c0_15 = arith.constant 0 : index
        %24 = vector.load %arg12[%c0_14, %c0_15] : memref<1x32xf32, #tpu.memory_space<vmem>>, vector<1x32xf32>
        %cst_16 = arith.constant 3.125000e-02 : f32
        %25 = vector.broadcast %cst_16 : f32 to vector<1x32xf32>
        %26 = arith.mulf %24, %25 : vector<1x32xf32>
        %27 = arith.mulf %23, %23 : vector<1x32xf32>
        %28 = arith.subf %26, %27 : vector<1x32xf32>
        %cst_17 = arith.constant 0.000000e+00 : f32
        %29 = vector.broadcast %cst_17 : f32 to vector<1x32xf32>
        %30 = arith.maximumf %28, %29 : vector<1x32xf32>
        %c0_18 = arith.constant 0 : index
        %c0_19 = arith.constant 0 : index
        %31 = vector.load %arg8[%c0_18, %c0_19] : memref<1x32xf32, #tpu.memory_space<vmem>>, vector<1x32xf32>
        %cst_20 = arith.constant 9.99999974E-6 : f32
        %32 = vector.broadcast %cst_20 : f32 to vector<1x32xf32>
        %33 = arith.addf %30, %32 : vector<1x32xf32>
        %34 = math.rsqrt %33 : vector<1x32xf32>
        %35 = arith.mulf %31, %34 : vector<1x32xf32>
        %c0_21 = arith.constant 0 : index
        %c0_22 = arith.constant 0 : index
        %36 = vector.load %arg13[%c0_21, %c0_22] : memref<1x32xf32, #tpu.memory_space<vmem>>, vector<1x32xf32>
        tpu.vector_store %arg13[%c0_21, %c0_22], %35 {strides = array<i32>} : memref<1x32xf32, #tpu.memory_space<vmem>>, vector<1x32xf32>,
        %c0_23 = arith.constant 0 : index
        %c0_24 = arith.constant 0 : index
        %37 = vector.load %arg9[%c0_23, %c0_24] : memref<1x32xf32, #tpu.memory_space<vmem>>, vector<1x32xf32>
        %38 = arith.mulf %23, %35 : vector<1x32xf32>
        %39 = arith.subf %37, %38 : vector<1x32xf32>
        %c0_25 = arith.constant 0 : index
        %c0_26 = arith.constant 0 : index
        %40 = vector.load %arg14[%c0_25, %c0_26] : memref<1x32xf32, #tpu.memory_space<vmem>>, vector<1x32xf32>
        tpu.vector_store %arg14[%c0_25, %c0_26], %39 {strides = array<i32>} : memref<1x32xf32, #tpu.memory_space<vmem>>, vector<1x32xf32>,
      } else {
      }
      %9 = arith.index_cast %arg1 : i32 to index
      %c0 = arith.constant 0 : index
      %c0_4 = arith.constant 0 : index
      %10 = vector.load %arg15[%9, %c0, %c0_4] : memref<1x32x32xf32, #tpu.memory_space<vmem>>, vector<1x32x32xf32>
      %11 = vector.shape_cast %10 : vector<1x32x32xf32> to vector<32x32xf32>
      %c0_5 = arith.constant 0 : index
      %c0_6 = arith.constant 0 : index
      %12 = vector.load %arg13[%c0_5, %c0_6] : memref<1x32xf32, #tpu.memory_space<vmem>>, vector<1x32xf32>
      %13 = vector.broadcast %12 : vector<1x32xf32> to vector<32x32xf32>
      %14 = arith.mulf %11, %13 : vector<32x32xf32>
      %c0_7 = arith.constant 0 : index
      %c0_8 = arith.constant 0 : index
      %15 = vector.load %arg14[%c0_7, %c0_8] : memref<1x32xf32, #tpu.memory_space<vmem>>, vector<1x32xf32>
      %16 = vector.broadcast %15 : vector<1x32xf32> to vector<32x32xf32>
      %17 = arith.addf %14, %16 : vector<32x32xf32>
      %cst = arith.constant 0.000000e+00 : f32
      %18 = vector.broadcast %cst : f32 to vector<32x32xf32>
      %19 = arith.maximumf %17, %18 : vector<32x32xf32>
      %c0_9 = arith.constant 0 : index
      %c0_10 = arith.constant 0 : index
      %20 = vector.load %arg10[%c0_9, %c0_10] : memref<32x32xf32, #tpu.memory_space<vmem>>, vector<32x32xf32>
      tpu.vector_store %arg10[%c0_9, %c0_10], %19 {strides = array<i32>} : memref<32x32xf32, #tpu.memory_space<vmem>>, vector<32x32xf32>,
    } else {
    }
    return
  }
  func.func @transform_0(%arg0: i32, %arg1: i32) -> (i32, i32) {
    %c1_i32 = arith.constant 1 : i32
    %0 = arith.subi %c1_i32, %arg0 : i32
    %1 = arith.muli %arg1, %0 : i32
    %c0_i32 = arith.constant 0 : i32
    %2 = arith.muli %c0_i32, %arg0 : i32
    %3 = arith.addi %1, %2 : i32
    %c0_i32_0 = arith.constant 0 : i32
    %c0_i32_1 = arith.constant 0 : i32
    return %3, %c0_i32_0 : i32, i32
  }
  func.func @transform_1(%arg0: i32, %arg1: i32) -> (i32, i32) {
    %c0_i32 = arith.constant 0 : i32
    %c0_i32_0 = arith.constant 0 : i32
    %c0_i32_1 = arith.constant 0 : i32
    return %c0_i32, %c0_i32_0 : i32, i32
  }
  func.func @transform_2(%arg0: i32, %arg1: i32) -> (i32, i32) {
    %c0_i32 = arith.constant 0 : i32
    %c0_i32_0 = arith.constant 0 : i32
    %c0_i32_1 = arith.constant 0 : i32
    return %c0_i32, %c0_i32_0 : i32, i32
  }
  func.func @transform_3(%arg0: i32, %arg1: i32) -> (i32, i32) {
    %c0_i32 = arith.constant 0 : i32
    %c0_i32_0 = arith.constant 0 : i32
    %c0_i32_1 = arith.constant 0 : i32
    return %c0_i32, %c0_i32_0 : i32, i32
  }
  func.func @transform_4(%arg0: i32, %arg1: i32) -> (i32, i32) {
    %c0_i32 = arith.constant 0 : i32
    %c0_i32_0 = arith.constant 0 : i32
    %c0_i32_1 = arith.constant 0 : i32
    return %c0_i32, %c0_i32_0 : i32, i32
  }
  func.func @transform_5(%arg0: i32, %arg1: i32) -> (i32, i32) {
    %c0_i32 = arith.constant 0 : i32
    %c0_i32_0 = arith.constant 0 : i32
    %c0_i32_1 = arith.constant 0 : i32
    return %c0_i32, %c0_i32_0 : i32, i32
  }
  func.func @transform_6(%arg0: i32, %arg1: i32) -> (i32, i32) {
    %c0_i32 = arith.constant 0 : i32
    %c0_i32_0 = arith.constant 0 : i32
    %c0_i32_1 = arith.constant 0 : i32
    return %c0_i32, %c0_i32_0 : i32, i32
  }
  func.func @transform_7(%arg0: i32, %arg1: i32) -> (i32, i32) {
    %c0_i32 = arith.constant 0 : i32
    %c0_i32_0 = arith.constant 0 : i32
    %c0_i32_1 = arith.constant 0 : i32
    return %c0_i32, %c0_i32_0 : i32, i32
  }
  func.func @transform_8(%arg0: i32, %arg1: i32) -> (i32, i32) {
    %0 = arith.muli %arg1, %arg0 : i32
    %c0_i32 = arith.constant 0 : i32
    %c0_i32_0 = arith.constant 0 : i32
    return %0, %c0_i32 : i32, i32
  }
}

</mosaic_0001>

<bundles_post_ra>
// kernel: tpu_custom_call.1
= control target key start
LH: loop header
LB: loop body
LE: loop exit
PB: predicated region body
PF: predicated region fallthrough
CT: control target
= control target key end

     0   :  { %13 = vsyncpa [#allocation8], 0  ;;  %s1768_s0 = inlined_call_operand.vmem [shape: f32[32,32], index: 0, kind: input, shape index: {}]   ;;  %s1769_s1 = inlined_call_operand.hbm [shape: f32[32,32], index: 1, kind: input, shape index: {}]   ;;  %s1770_s2 = inlined_call_operand.hbm [shape: f32[32,32], index: 2, kind: input, shape index: {}]   ;;  %s1771_s3 = inlined_call_operand.hbm [shape: f32[16,16], index: 3, kind: input, shape index: {}]   ;;  %s1772_s4 = inlined_call_operand.vmem [shape: f32[32,1], index: 4, kind: input, shape index: {}]   ;;  %s1773_s5 = inlined_call_operand.vmem [shape: f32[1,32], index: 5, kind: input, shape index: {}]   ;;  %s1774_s6 = inlined_call_operand.vmem [shape: f32[1,32], index: 6, kind: input, shape index: {}]   ;;  %s1775_s7 = inlined_call_operand.vmem [shape: f32[1,32], index: 7, kind: input, shape index: {}]   ;;  %s1776_s8 = inlined_call_operand.hbm [shape: f32[32,32], index: 8, kind: output, shape index: {}]  }
   0x1   :  { %14 = vsyncpa [#allocation11], 0 }
   0x2   :  { %15 = vsyncpa [#allocation9], 0 }
   0x3   :  { %17 = vsyncpa [#allocation9 + $0x1], 0  ;;  %s1529_s27 = smov 0   ;;  %s1531_s28 = smov 0  }
   0x4   :  { %s1533_s29 = smov 0  }
   0x5 LB: > { %1782 = sst [smem:[#allocation17_spill]] %s1468_s28  ;;  %s1780_s30 = sadd.s32 4294967295, %s1472_s29   ;;  %s1472_s29 = sphi %s1533_s29, %s23_s29   ;;  %s1468_s28 = sphi %s1531_s28, %s1795_s28   ;;  %s1464_s27 = sphi %s1529_s27, %s1794_s27  }
   0x6   : > { %p1122_p0 = scmp.ge.s32.totalorder %s1472_s29, 1  ;;  %p245_p1 = scmp.lt.s32.totalorder %s1472_s29, 3 }
   0x7   : > { %p1550_p2 = scmp.eq.s32.totalorder %s1780_s30, 0  ;;  %s1474_s12 = smov [#allocation10]  }
   0x8   : > { %p1554_p3 = pnand %p1122_p0, %p245_p1  ;;  %s270_s13 = sshll.u32 %s1474_s12, 4  ;;  %s271_s13 = int_to_ptr.vmem [resolvable:$true] %s270_s13 }
   0x9   : > { %s1783_s10 = scalar_select %p1550_p2, 1, 0 }
   0xa   : > { %s1784_s11 = scalar_select %p1554_p3, 1, 0 }
   0xb   : > { %p1267_p4 = pneg %p1554_p3  ;;  %s35_s15 = sadd.s32 1, %s1468_s28 }
   0xc   : > { %p1567_p6 = scmp.ge.s32.totalorder %s35_s15, 2  ;;  %s1328_s19 = scalar_lea.hbm %s1770_s2, 512 }
   0xd   : > { %p1562_p5 = pnand %p1550_p2, %p1267_p4  ;;  %p1329_p7 = scmp.ne.s32.totalorder %s1770_s2, %s1328_s19 }
   0xe   : > { %s1786_s16 = scalar_select %p1567_p6, 1, 0 }
   0xf   : > { %p1579_p8 = pneg %p1562_p5  ;;  %p1335_p11 = scmp.lt.u32.totalorder %s1328_s19, %s1770_s2 }
  0x11   : > { %p1331_p9 = pnand %p1579_p8, %p1329_p7 }
  0x13   : > { %p1332_p10 = pneg %p1331_p9 }
  0x15   : > { %p1337_p12 = pnand %p1335_p11, %p1332_p10 }
  0x17   : > { %1340 = shalt.err (!%p1337_p12)
}
  0x18   : > { %s1341_s25 = scalar_lea.vmem %s271_s13, 512  ;;  %p1349_p4 = scmp.lt.s32.totalorder %s271_s13, %s271_s13 }
  0x19   : > { %p1342_p13 = scmp.ne.s32.totalorder %s271_s13, %s1341_s25  ;;  %p1350_p2 = scmp.lt.s32.totalorder %s1341_s25, %s1341_s25 }
  0x1b   : > { %p1344_p0 = pnand %p1342_p13, %p1579_p8  ;;  %p1351_p3 = por %p1350_p2, %p1349_p4 }
  0x1d   : > { %p1345_p1 = pneg %p1344_p0 }
  0x1f   : > { %p1352_p6 = pnand %p1351_p3, %p1345_p1 }
  0x21   : > { %1355 = shalt.err (!%p1352_p6)
}
  0x22   : > { %s1475_s26 = smov 128   ;;  %s1476_s12 = smov 8  }
  0x23   : > { %1273 = dma.hbm_to_vmem [thread:$0]  (!%p1562_p5), %s1770_s2, 512, %s271_s13, [#allocation11], %s1475_s26, %s1475_s26, %s1476_s12  }
  0x24   : > { %p1788_p7 = scmp.ne.s32.totalorder %s1786_s16, 0  ;;  %s1477_s19 = smov [#allocation7]  }
  0x25   : > { %s257_s20 = sshll.u32 %s1477_s19, 4  ;;  %s1478_s21 = smov [#allocation12]   ;;  %s258_s20 = int_to_ptr.vmem [resolvable:$true] %s257_s20 }
  0x26   : > { %s1797_s15 = smov (%p1788_p7, %s35_s15), 0  ;;  %s283_s23 = sshll.u32 %s1478_s21, 4  ;;  %s284_s23 = int_to_ptr.vmem [resolvable:$true] %s283_s23 }
  0x27   : > { %s1356_s9 = scalar_lea.hbm %s1769_s1, 512 }
  0x28   : > { %p1357_p2 = scmp.ne.s32.totalorder %s1769_s1, %s1356_s9  ;;  %p1363_p9 = scmp.lt.u32.totalorder %s1356_s9, %s1769_s1 }
  0x2a   : > { %p1359_p3 = pnand %p1357_p2, %p1579_p8 }
  0x2c   : > { %p1360_p6 = pneg %p1359_p3 }
  0x2e   : > { %p1365_p10 = pnand %p1363_p9, %p1360_p6 }
  0x30   : > { %1368 = shalt.err (!%p1365_p10)
}
  0x31   : > { %s1369_s17 = scalar_lea.vmem %s258_s20, 512  ;;  %p1377_p0 = scmp.lt.s32.totalorder %s258_s20, %s258_s20 }
  0x32   : > { %p1370_p11 = scmp.ne.s32.totalorder %s258_s20, %s1369_s17  ;;  %p1378_p1 = scmp.lt.s32.totalorder %s1369_s17, %s1369_s17 }
  0x34   : > { %p1372_p12 = pnand %p1370_p11, %p1579_p8  ;;  %p1379_p4 = por %p1378_p1, %p1377_p0 }
  0x36   : > { %p1373_p13 = pneg %p1372_p12 }
  0x38   : > { %p1380_p7 = pnand %p1379_p4, %p1373_p13 }
  0x3a   : > { %1383 = shalt.err (!%p1380_p7)
}
  0x3b   : > { %1270 = dma.hbm_to_vmem [thread:$0]  (!%p1562_p5), %s1769_s1, 512, %s258_s20, [#allocation8], %s1475_s26, %s1475_s26, %s1476_s12  }
  0x3c   : > { %s1384_s19 = scalar_lea.hbm %s1771_s3, 256 }
  0x3d   : > { %p1385_p2 = scmp.ne.s32.totalorder %s1771_s3, %s1384_s19  ;;  %p1391_p9 = scmp.lt.u32.totalorder %s1384_s19, %s1771_s3 }
  0x3f   : > { %p1387_p3 = pnand %p1385_p2, %p1579_p8 }
  0x41   : > { %p1388_p6 = pneg %p1387_p3 }
  0x43   : > { %p1393_p10 = pnand %p1391_p9, %p1388_p6 }
  0x45   : > { %1396 = shalt.err (!%p1393_p10)
}
  0x46   : > { %s1397_s16 = scalar_lea.vmem %s284_s23, 256  ;;  %p1405_p0 = scmp.lt.s32.totalorder %s284_s23, %s284_s23 }
  0x47   : > { %p1398_p11 = scmp.ne.s32.totalorder %s284_s23, %s1397_s16  ;;  %p1406_p1 = scmp.lt.s32.totalorder %s1397_s16, %s1397_s16 }
  0x49   : > { %p1400_p12 = pnand %p1398_p11, %p1579_p8  ;;  %p1407_p4 = por %p1406_p1, %p1405_p0 }
  0x4b   : > { %p1401_p13 = pneg %p1400_p12 }
  0x4d   : > { %p1408_p7 = pnand %p1407_p4, %p1401_p13 }
  0x4f   : > { %1411 = shalt.err (!%p1408_p7)
}
  0x50   : > { %1276 = dma.hbm_to_vmem [thread:$0]  (!%p1562_p5), %s1771_s3, 256, %s284_s23, [#allocation11], %s1475_s26, %s1475_s26, %s1476_s12  }
  0x51   : > { %p1789_p2 = scmp.ne.s32.totalorder %s1784_s11, 0 }
  0x52   : > { %p1790_p8 = scmp.ne.s32.totalorder (!%p1789_p2), %s1783_s10, 0 }
  0x53   : > { %324 = sbr.rel (%p1789_p2) target bundleno = 911 (0x38f), region = 52 }
  0x5a   : > { %1451 = dma.done.wait (%p1790_p8), [#allocation8], 512  }
  0x5b   : > { %1453 = vsyncadd (%p1790_p8), [#allocation8], 4294966784 }
  0x5c   : > { %1455 = dma.done.wait (%p1790_p8), [#allocation11], 768  }
  0x5d   : > { %1457 = vsyncadd (%p1790_p8), [#allocation11], 4294966528  ;;  %p1132_p3 = scmp.ne.s32.totalorder %s1464_s27, 0 }
  0x5e   : > { %v395_v0 = vld [vmem:[#allocation7] sm:$0xff] (!%p1132_p3)  ;;  %v396_v1 = vld [vmem:[#allocation7 + $0x8] sm:$0xff] (!%p1132_p3)  ;;  %v397_v2 = vld [vmem:[#allocation7 + $0x10] sm:$0xff] (!%p1132_p3)  ;;  %vm399_vm0 = vcmask (!%p1132_p3), 261120   ;;  %vm680_vm1 = vcmask (!%p1132_p3), 130048   ;;  %v1479_v27 = vmov (!%p1132_p3), 0  }
  0x5f   : > { %383 = sbr.rel (%p1132_p3) target bundleno = 841 (0x349), region = 68  ;;  %v1229_v3 = vpack.c.bf16 (!%p1132_p3), %v396_v1, %v395_v0  ;;  %v398_v4 = vld [vmem:[#allocation7 + $0x18] sm:$0xff] (!%p1132_p3)  ;;  %v497_v7 = vld [vmem:[#allocation10] sm:$0xff] (!%p1132_p3)  ;;  %v498_v8 = vld [vmem:[#allocation10 + $0x8] sm:$0xff] (!%p1132_p3)  ;;  %vm388_vm3 = vcmask (!%p1132_p3), 253952   ;;  %v1480_v48 = vmov (!%p1132_p3), 0.0  }
  0x60   : > { %v391_v5 = vld [vmem:[%s1768_s0] sm:$0xff] (!%p1132_p3)  ;;  %v1233_v6 = vpack.c.bf16 (!%p1132_p3), %v398_v4, %v397_v2  ;;  %v1237_v9 = vpack.c.bf16 (!%p1132_p3), %v498_v8, %v497_v7  ;;  %v499_v10 = vld [vmem:[#allocation10 + $0x10] sm:$0xff] (!%p1132_p3)  ;;  %v392_v12 = vld [vmem:[%s1768_s0 + $0x8] sm:$0xff] (!%p1132_p3)  ;;  %389 = vst.msk [vmem:[#allocation2] sm:$0x1] (!%p1132_p3), %vm388_vm3, %v1480_v48 }
  0x61   : > { %1193 = vmatprep.mubr.msk.f32.mxu1 (!%p1132_p3), %vm399_vm0, %v391_v5  ;;  %1230 = vmatprep.subr.bf16.mxu1 (!%p1132_p3), %v1229_v3  ;;  %v500_v11 = vld [vmem:[#allocation10 + $0x18] sm:$0xff] (!%p1132_p3)  ;;  %v393_v13 = vld [vmem:[%s1768_s0 + $0x10] sm:$0xff] (!%p1132_p3)  ;;  %v614_v16 = vld [vmem:[#allocation12] sm:$0xff] (!%p1132_p3)  ;;  %390 = vst.msk [vmem:[#allocation3] sm:$0x1] (!%p1132_p3), %vm388_vm3, %v1480_v48 }
  0x62   : > { %1232 = vmatpush3.bf16.msra.mxu1 (!%p1132_p3), %v1229_v3  ;;  %v1241_v14 = vpack.c.bf16 (!%p1132_p3), %v500_v11, %v499_v10  ;;  %v394_v15 = vld [vmem:[%s1768_s0 + $0x18] sm:$0xff] (!%p1132_p3)  ;;  %v615_v17 = vld [vmem:[#allocation12 + $0x8] sm:$0xff] (!%p1132_p3)  ;;  %vm1246_vm2 = vmpackc.low (!%p1132_p3), %vm680_vm1, %vm680_vm1 }
  0x63   : > { %1234 = vmatprep.subr.bf16.mxu1 (!%p1132_p3), %v1233_v6  ;;  %v1245_v18 = vpack.c.bf16 (!%p1132_p3), %v615_v17, %v614_v16  ;;  %v587_v28 = vld [vmem:[%s1772_s4 + $0x8] sm:$0xff] (!%p1132_p3)  ;;  %v588_v29 = vld [vmem:[%s1772_s4 + $0x10] sm:$0xff] (!%p1132_p3)  ;;  %v586_v30 = vld [vmem:[%s1772_s4] sm:$0xff] (!%p1132_p3) }
  0x64   : > { %v589_v31 = vld [vmem:[%s1772_s4 + $0x18] sm:$0xff] (!%p1132_p3)  ;;  %v1151_v54 = vld [vmem:[%s1773_s5] ss:$0 sm:$0xff] (!%p1132_p3) }
  0x65   : > { %1247 = vmatprep.subr.msk.bf16.mxu0 (!%p1132_p3), %vm1246_vm2, %v1245_v18 }
  0x66   : > { %1236 = vmatpush3.bf16.msra.mxu1 %v1233_v6  ;;  %1250 = vmatpush3.bf16.xpose.msk.msra.mxu0 %vm1246_vm2, %v1245_v18 }
  0x67   : > { %1238 = vmatprep.subr.bf16.mxu1 %v1237_v9 }
  0x69   : > { %1194 = vmatmul.mubr.msk.f32.vlgmr.msra.gmra.mrb[0].mxu1 %vm399_vm0, %v392_v12 }
  0x6a   : > { %1240 = vmatpush3.bf16.msra.mxu1 %v1237_v9  ;;  %1196 = vmatprep.mubr.msk.f32.mxu1 %vm399_vm0, %v393_v13 }
  0x6b   : > { %1242 = vmatprep.subr.bf16.mxu1 %v1241_v14 }
  0x6d   : > { %1197 = vmatmul.mubr.msk.f32.gmra.mrb[2].mxu1 %vm399_vm0, %v394_v15 }
  0x6e   : > { %1244 = vmatpush3.bf16.msra.mxu1 %v1241_v14  ;;  %1207 = vmatprep.mubr.msk.f32.mxu1 %vm399_vm0, %v391_v5 }
  0x71   : > { %1208 = vmatmul.mubr.msk.f32.vlgmr.msra.gmra.mrb[4].mxu1 %vm399_vm0, %v392_v12 }
  0x72   : > { %1210 = vmatprep.mubr.msk.f32.mxu1 %vm399_vm0, %v393_v13 }
  0x75   : > { %1211 = vmatmul.mubr.msk.f32.gmra.mrb[6].mxu1 %vm399_vm0, %v394_v15 }
 0x13c   : > { %v1677_v19 = vpop.f32.mrb[0].mxu1 }
 0x13d   : > { %v478_v20 = vpop.f32.mrb[1].mxu1 }
 0x140   : > { %v1679_v21 = vpop.f32.mrb[2].mxu1 }
 0x141   : > { %v1681_v22 = vpop.f32.mrb[3].mxu1 }
 0x144   : > { %v1209_v23 = vpop.f32.mrb[4].mxu1 }
 0x145   : > { %v567_v24 = vpop.f32.mrb[5].mxu1 }
 0x146   : > { %616 = vxpose.xlu0.b32.start [1/2] (short) (narrow) %v567_v24, 32 }
 0x148   : > { %v1212_v25 = vpop.f32.mrb[6].mxu1 }
 0x149   : > { %v577_v26 = vpop.f32.mrb[7].mxu1 }
 0x14a   : > { %617 = vxpose.xlu0.b32.end [2/2] (short) (narrow) %v1209_v23, 32  ;;  %648 = vxpose.xlu1.b32.start [1/2] (short) (narrow) %v577_v26, 32 }
 0x14e   : > { %649 = vxpose.xlu1.b32.end [2/2] (short) (narrow) %v1212_v25, 32 }
 0x16c   : > { %1325 = vset.pattern.permute.xlu1 %v1479_v27 }
 0x173   : > { %1324 = vset.pattern.permute.xlu0 %v1479_v27 }
 0x174   : > { %597 = vperm.xlu1 %1325, %v587_v28  }
 0x178   : > { %602 = vperm.xlu1 %1325, %v588_v29  }
 0x17b   : > { %592 = vperm.xlu0 %1324, %v586_v30  }
 0x17c   : > { %607 = vperm.xlu1 %1325, %v589_v31  }
 0x1c6   : > { %v632_v32 = vpop.trf.xlu0 }
 0x1c7   : > { %1217 = vmatprep.mubr.msk.f32.mxu0 %vm680_vm1, %v632_v32 }
 0x1ca   : > { %v633_v33 = vpop.trf.xlu0  ;;  %v664_v34 = vpop.trf.xlu1 }
 0x1cb   : > { %1218 = vmatmul.mubr.msk.f32.vlgmr.msra.gmra.mrb[0].mxu0 %vm680_vm1, %v633_v33  ;;  %v901_v33 = vld [vmem:[#allocation2] sm:$0x1] }
 0x1ce   : > { %v634_v35 = vpop.trf.xlu0  ;;  %v665_v36 = vpop.trf.xlu1 }
 0x1cf   : > { %1220 = vmatprep.mubr.msk.f32.mxu0 %vm680_vm1, %v634_v35 }
 0x1d2   : > { %v635_v37 = vpop.trf.xlu0  ;;  %v666_v38 = vpop.trf.xlu1 }
 0x1d3   : > { %1221 = vmatmul.mubr.msk.f32.gmra.mrb[2].mxu0 %vm680_vm1, %v635_v37 }
 0x1d4   : > { %1223 = vmatprep.mubr.msk.f32.mxu0 %vm680_vm1, %v664_v34 }
 0x1d6   : > { %v667_v39 = vpop.trf.xlu1 }
 0x1d7   : > { %1224 = vmatmul.mubr.msk.f32.gmra.mrb[4].mxu0 %vm680_vm1, %v665_v36  ;;  %v918_v36 = vld [vmem:[#allocation3] sm:$0x1] }
 0x1d8   : > { %1226 = vmatprep.mubr.msk.f32.mxu0 %vm680_vm1, %v666_v38 }
 0x1db   : > { %1227 = vmatmul.mubr.msk.f32.gmra.mrb[6].mxu0 %vm680_vm1, %v667_v39 }
 0x1f3   : > { %v598_v49 = vpop.permute.xlu1 %597 }
 0x1f4   : > { %v611_v57 = vmul.f32 %v1677_v19, %v598_v49 }
 0x1f7   : > { %v603_v50 = vpop.permute.xlu1 %602 }
 0x1f8   : > { %v612_v3 = vmul.f32 %v603_v50, %v1681_v22 }
 0x1fa   : > { %v593_v51 = vpop.permute.xlu0 %592 }
 0x1fb   : > { %v608_v52 = vpop.permute.xlu1 %607  ;;  %v610_v53 = vmul.f32 %v593_v51, %v478_v20 }
 0x1fc   : > { %v613_v9 = vmul.f32 %v1679_v21, %v608_v52 }
 0x29e   : > { %v1219_v40 = vpop.f32.mrb[0].mxu0 }
 0x29f   : > { %v777_v41 = vpop.f32.mrb[1].mxu0 }
 0x2a0   : > { %816 = vxpose.xlu1.b32.start [1/4] (short) (narrow) %v777_v41, 16 }
 0x2a4   : > { %817 = vxpose.xlu1.b32.cont [2/4] (short) (narrow) %v1219_v40, 16 }
 0x2a6   : > { %v1222_v42 = vpop.f32.mrb[2].mxu0 }
 0x2a7   : > { %v787_v43 = vpop.f32.mrb[3].mxu0 }
 0x2a8   : > { %818 = vxpose.xlu1.b32.cont [3/4] (short) (narrow) %v787_v43, 16 }
 0x2aa   : > { %v1225_v44 = vpop.f32.mrb[4].mxu0 }
 0x2ab   : > { %v797_v45 = vpop.f32.mrb[5].mxu0 }
 0x2ac   : > { %819 = vxpose.xlu1.b32.end [4/4] (short) (narrow) %v1222_v42, 16  ;;  %848 = vxpose.xlu0.b32.start [1/4] (short) (narrow) %v797_v45, 16 }
 0x2ae   : > { %v1228_v46 = vpop.f32.mrb[6].mxu0 }
 0x2af   : > { %v807_v47 = vpop.f32.mrb[7].mxu0 }
 0x2b0   : > { %849 = vxpose.xlu0.b32.cont [2/4] (short) (narrow) %v1225_v44, 16 }
 0x2b4   : > { %850 = vxpose.xlu0.b32.cont [3/4] (short) (narrow) %v807_v47, 16 }
 0x2b8   : > { %851 = vxpose.xlu0.b32.end [4/4] (short) (narrow) %v1228_v46, 16 }
 0x320   : > { %v832_v55 = vpop.trf.xlu1 }
 0x321   : > { %v880_v56 = vadd.f32 %v832_v55, %v610_v53 }
 0x323   : > { %v891_v58 = vadd.f32 %v1151_v54, %v880_v56 }
 0x324   : > { %v833_v59 = vpop.trf.xlu1 }
 0x325   : > { %897 = vst.msk [vmem:[#allocation6] sm:$0xff] %vm399_vm0, %v891_v58  ;;  %v881_v60 = vadd.f32 %v833_v59, %v611_v57  ;;  %v919_v61 = vmul.f32 %v891_v58, %v891_v58  ;;  %v902_v63 = vsel %vm399_vm0, %v891_v58, 0.0 }
 0x327   : > { %v892_v62 = vadd.f32 %v1151_v54, %v881_v60  ;;  %v923_v4 = vsel %vm399_vm0, %v919_v61, 0.0 }
 0x329   : > { %898 = vst.msk [vmem:[#allocation6 + $0x8] sm:$0xff] %vm399_vm0, %v892_v62  ;;  %v903_v0 = vsel %vm399_vm0, %v892_v62, 0.0  ;;  %v920_v1 = vmul.f32 %v892_v62, %v892_v62 }
 0x32a   : > { %v904_v2 = vadd.f32 %v903_v0, %v902_v63 }
 0x32b   : > { %v924_v5 = vsel %vm399_vm0, %v920_v1, 0.0 }
 0x32c   : > { %v925_v6 = vadd.f32 %v924_v5, %v923_v4  ;;  %v864_v7 = vpop.trf.xlu0 }
 0x32d   : > { %v882_v8 = vadd.f32 %v864_v7, %v612_v3 }
 0x32f   : > { %v893_v10 = vadd.f32 %v1151_v54, %v882_v8 }
 0x330   : > { %v865_v11 = vpop.trf.xlu0 }
 0x331   : > { %899 = vst.msk [vmem:[#allocation6 + $0x10] sm:$0xff] %vm399_vm0, %v893_v10  ;;  %v905_v12 = vsel %vm399_vm0, %v893_v10, 0.0  ;;  %v921_v13 = vmul.f32 %v893_v10, %v893_v10  ;;  %v883_v14 = vadd.f32 %v865_v11, %v613_v9 }
 0x332   : > { %v906_v15 = vadd.f32 %v905_v12, %v904_v2 }
 0x333   : > { %v926_v16 = vsel %vm399_vm0, %v921_v13, 0.0  ;;  %v894_v17 = vadd.f32 %v1151_v54, %v883_v14 }
 0x334   : > { %v927_v18 = vadd.f32 %v926_v16, %v925_v6 }
 0x335   : > { %900 = vst.msk [vmem:[#allocation6 + $0x18] sm:$0xff] %vm399_vm0, %v894_v17  ;;  %v907_v19 = vsel %vm399_vm0, %v894_v17, 0.0  ;;  %v922_v20 = vmul.f32 %v894_v17, %v894_v17 }
 0x336   : > { %v908_v22 = vadd.f32 %v907_v19, %v906_v15 }
 0x337   : > { %v928_v21 = vsel %vm399_vm0, %v922_v20, 0.0 }
 0x338   : > { %v909_v23 = vrot.slane %v908_v22, 4  ;;  %v929_v24 = vadd.f32 %v928_v21, %v927_v18 }
 0x33a   : > { %v910_v25 = vadd.f32 %v909_v23, %v908_v22  ;;  %v930_v26 = vrot.slane %v929_v24, 4 }
 0x33c   : > { %v911_v27 = vrot.slane %v910_v25, 2  ;;  %v931_v28 = vadd.f32 %v930_v26, %v929_v24 }
 0x33e   : > { %v912_v29 = vadd.f32 %v911_v27, %v910_v25  ;;  %v932_v30 = vrot.slane %v931_v28, 2 }
 0x340   : > { %v913_v31 = vrot.slane %v912_v29, 1  ;;  %v933_v32 = vadd.f32 %v932_v30, %v931_v28 }
 0x342   : > { %v914_v34 = vadd.f32 %v913_v31, %v912_v29  ;;  %v934_v35 = vrot.slane %v933_v32, 1 }
 0x344   : > { %v915_v37 = vadd.f32 %v914_v34, %v901_v33  ;;  %v935_v38 = vadd.f32 %v934_v35, %v933_v32 }
 0x346   : > { %917 = vst.msk [vmem:[#allocation2] sm:$0x1] %vm388_vm3, %v915_v37  ;;  %v936_v39 = vadd.f32 %v935_v38, %v918_v36 }
 0x348   : > { %937 = vst.msk [vmem:[#allocation3] sm:$0x1] %vm388_vm3, %v936_v39 }
 0x349 PF: > { %p1152_p5 = scmp.ne.s32.totalorder %s1464_s27, 1 }
 0x34a   : > { %v953_v48 = vld [vmem:[%s1774_s6] sm:$0x1] (!%p1152_p5)  ;;  %vm957_vm4 = vcmask (!%p1152_p5), 253952   ;;  %v965_v54 = vld [vmem:[#allocation6] sm:$0xff] (!%p1152_p5)  ;;  %v966_v55 = vld [vmem:[#allocation6 + $0x8] sm:$0xff] (!%p1152_p5)  ;;  %vm995_vm5 = vcmask (!%p1152_p5), 261120  }
 0x34b   : > { %941 = sbr.rel (%p1152_p5) target bundleno = 887 (0x377), region = 76  ;;  %v959_v51 = vld [vmem:[%s1775_s7] sm:$0x1] (!%p1152_p5)  ;;  %v967_v56 = vld [vmem:[#allocation6 + $0x10] sm:$0xff] (!%p1152_p5) }
 0x34c   : > { %v968_v57 = vld [vmem:[#allocation6 + $0x18] sm:$0xff] (!%p1152_p5) }
 0x34d   : > { %v946_v40 = vld [vmem:[#allocation2] sm:$0x1] (!%p1152_p5) }
 0x34e   : > { %v947_v42 = vmul.f32 (!%p1152_p5), 0.03125, %v946_v40 }
 0x34f   : > { %v948_v41 = vld [vmem:[#allocation3] sm:$0x1] (!%p1152_p5) }
 0x350   : > { %v949_v43 = vmul.f32 (!%p1152_p5), 0.03125, %v948_v41  ;;  %v950_v44 = vmul.f32 (!%p1152_p5), %v947_v42, %v947_v42 }
 0x352   : > { %v951_v45 = vsub.f32 %v949_v43, %v950_v44 }
 0x354   : > { %v952_v46 = vmax.f32 %v951_v45, 0.0 }
 0x356   : > { %v954_v47 = vadd.f32 1e-05, %v952_v46 }
 0x358   : > { %1326 = vrsqrt.f32 %v954_v47 }
 0x362   : > { %v1327_v49 = vpop.eup %1326 }
 0x363   : > { %v956_v50 = vmul.f32 %v1327_v49, %v953_v48 }
 0x365   : > { %958 = vst.msk [vmem:[#allocation4] sm:$0x1] %vm957_vm4, %v956_v50  ;;  %v960_v52 = vmul.f32 %v956_v50, %v947_v42 }
 0x367   : > { %v961_v53 = vsub.f32 %v959_v51, %v960_v52 }
 0x369   : > { %962 = vst.msk [vmem:[#allocation5] sm:$0x1] %vm957_vm4, %v961_v53 }
 0x36c   : > { %v1153_v58 = vld [vmem:[#allocation4] ss:$0 sm:$0xff] }
 0x36d   : > { %v976_v59 = vmul.f32 %v1153_v58, %v965_v54  ;;  %v977_v60 = vmul.f32 %v1153_v58, %v966_v55  ;;  %v978_v61 = vmul.f32 %v1153_v58, %v967_v56  ;;  %v979_v62 = vmul.f32 %v1153_v58, %v968_v57 }
 0x370   : > { %v1154_v63 = vld [vmem:[#allocation5] ss:$0 sm:$0xff] }
 0x371   : > { %v987_v0 = vadd.f32 %v1154_v63, %v976_v59  ;;  %v988_v1 = vadd.f32 %v1154_v63, %v977_v60  ;;  %v989_v2 = vadd.f32 %v1154_v63, %v978_v61  ;;  %v990_v3 = vadd.f32 %v1154_v63, %v979_v62 }
 0x373   : > { %v991_v4 = vmax.f32 %v987_v0, 0.0  ;;  %v992_v5 = vmax.f32 %v988_v1, 0.0  ;;  %v993_v6 = vmax.f32 %v989_v2, 0.0  ;;  %v994_v7 = vmax.f32 %v990_v3, 0.0 }
 0x375   : > { %996 = vst.msk [vmem:[#allocation13] sm:$0xff] %vm995_vm5, %v991_v4  ;;  %997 = vst.msk [vmem:[#allocation13 + $0x8] sm:$0xff] %vm995_vm5, %v992_v5 }
 0x376   : > { %998 = vst.msk [vmem:[#allocation13 + $0x10] sm:$0xff] %vm995_vm5, %v993_v6  ;;  %999 = vst.msk [vmem:[#allocation13 + $0x18] sm:$0xff] %vm995_vm5, %v994_v7 }
 0x377 PF: > { %s1791_s27 = sadd.s32 4294967295, %s1472_s29   ;;  %s1481_s26 = smov [#allocation13]  }
 0x378   : > { %p1734_p6 = scmp.eq.s32.totalorder %s1791_s27, 1  ;;  %s1015_s12 = sshll.u32 %s1481_s26, 4  ;;  %s1016_s12 = int_to_ptr.vmem [resolvable:$true] %s1015_s12 }
 0x379   : > { %s1412_s23 = scalar_lea.vmem %s1016_s12, 512  ;;  %s1418_s28 = scalar_lea.vmem %s1016_s12, 1024 }
 0x37a   : > { %p1413_p9 = scmp.ne.s32.totalorder %s1016_s12, %s1412_s23  ;;  %p1419_p12 = scmp.lt.s32.totalorder %s1016_s12, %s1016_s12 }
 0x37b   : > { %p1420_p13 = scmp.lt.s32.totalorder %s1418_s28, %s1412_s23 }
 0x37c   : > { %p1414_p10 = pnand %p1413_p9, %p1734_p6 }
 0x37d   : > { %p1421_p0 = por %p1420_p13, %p1419_p12 }
 0x37e   : > { %p1415_p11 = pneg %p1414_p10 }
 0x380   : > { %p1422_p1 = pnand %p1421_p0, %p1415_p11 }
 0x382   : > { %1425 = shalt.err (!%p1422_p1)
}
 0x383   : > { %s1426_s18 = scalar_lea.hbm %s1776_s8, 512 }
 0x384   : > { %p1427_p4 = scmp.ne.s32.totalorder %s1776_s8, %s1426_s18  ;;  %p1432_p8 = scmp.lt.u32.totalorder %s1426_s18, %s1776_s8 }
 0x386   : > { %p1428_p7 = pnand %p1427_p4, %p1734_p6 }
 0x388   : > { %p1429_p2 = pneg %p1428_p7 }
 0x38a   : > { %p1434_p3 = pnand %p1432_p8, %p1429_p2 }
 0x38c   : > { %1437 = shalt.err (!%p1434_p3)
}
 0x38d   : > { %s1482_s13 = smov 128   ;;  %s1483_s16 = smov 8  }
 0x38e   : > { %1264 = dma.vmem_to_hbm [thread:$0]  (%p1734_p6), %s1016_s12, 512, %s1776_s8, [#allocation9], %s1482_s13, %s1482_s13, %s1483_s16  }
 0x38f PF: > { %p1288_p5 = scmp.ge.s32.totalorder %s1472_s29, 2  ;;  %s1793_s11 = sadd.s32 4294967294, %s1472_s29  }
 0x390   : > { %p1289_p9 = scmp.eq.s32.totalorder %s1793_s11, 1 }
 0x392   : > { %p1278_p10 = pnand %p1289_p9, %p1288_p5 }
 0x394   : > { %1459 = dma.done.wait (!%p1278_p10), [#allocation9], 512  }
 0x395   : > { %1461 = vsyncadd (!%p1278_p10), [#allocation9], 4294966784  ;;  %s23_s29 = sadd.s32 1, %s1472_s29   ;;  %s1794_s27 = sld [smem:[#allocation17_spill]] }
 0x396   : > { %p20_p11 = scmp.ge.s32.totalorder %s23_s29, 4   ;;  %s1795_s28 = smov %s1797_s15 }
 0x398   :  { %22 = sbr.rel (!%p20_p11) target bundleno = 5 (0x5), region = 118 }
 0x39f   :  { %1036 = vsyncpa [#allocation8], 1 }
 0x3a0   :  { %1038 = vsyncpa [#allocation8 + $0x1], 1 }
 0x3a1   :  { %1039 = vsyncpa [#allocation11], 1 }
 0x3a2   :  { %1040 = vsyncpa [#allocation9], 1 }
 0x3a3   :  { %1042 = vsyncpa [#allocation9 + $0x1], 1 }

</bundles_post_ra>
